<compile_context>
chip_gen: v7x
topology: tpu7x:2x2x1
jax: 0.10.0
libtpu: 0.0.40
codegen_flags: <defaults>
</compile_context>

<pallas_src>
import jax
import jax.numpy as jnp
from jax.experimental import pallas as pl
from jax.experimental.pallas import tpu as pltpu

FEATS = 4                 # input feature count of the module
GROUP = 128               # batch rows packed per output vector row (lane-dense)
PACK = GROUP * FEATS      # 512 input lanes per packed row
DEFAULT_TILE_R = 4096     # packed rows per grid step (= 512K batch rows,
                          # 8 MiB in + 2 MiB out per block)
SMALL_N = 16384           # below this, plain XLA beats any kernel launch


def _cdiv(a, b):
    return -(-a // b)


def _round_up(a, b):
    return _cdiv(a, b) * b


def mydense_kernel(x_ref, w_ref, o_ref):
    # x_ref: (tile, 512) -- 128 batch rows x 4 features per packed row.
    # w_ref: (512, 128)  -- block-diagonal expansion of the collapsed weight;
    #                       column j holds w_vec at rows 4j..4j+3.
    # o_ref: (tile, 128) -- lane-dense output, full-width unmasked stores.
    # One contraction performs the per-row 4-way reduction for 128 rows at a
    # time; the MXU rides in the otherwise-idle extended slot of this
    # HBM-bound stream.
    o_ref[...] = jnp.dot(
        x_ref[...], w_ref[...], preferred_element_type=jnp.float32
    ).astype(o_ref.dtype)


def mydense_forward(x, weights, *, tile_r=DEFAULT_TILE_R,
                    min_kernel_rows=SMALL_N):
    """x: (N, 4) float32; weights: [W0(4,4), W1(4,4), W2(4,4), W3(4,1)]."""
    n, k = x.shape
    assert k == FEATS, k

    # (1) Collapse the matmul chain (no nonlinearity) into one (4,) vector.
    w_eff = weights[0]
    for w in weights[1:]:
        w_eff = w_eff @ w                         # -> (4, 1)
    w_vec = w_eff.reshape(k).astype(x.dtype)      # (4,)

    n_main = (n // GROUP) * GROUP                 # 128-row-aligned prefix
    if n < min_kernel_rows or n_main == 0:
        # Small-N fast path: kernel launch/DMA overhead would dominate.
        return x @ w_vec[:, None]

    # (2) Aligned prefix through the kernel: free row-major reshape to a
    # lane-dense (r, 512) view; no pad pass, no extra HBM traffic.
    x_main = x if n_main == n else x[:n_main]
    r = n_main // GROUP
    x2 = x_main.reshape(r, PACK)

    # Block-diagonal expansion: w_blk[4*j + c, j] = w_vec[c].
    w_blk = (jnp.eye(GROUP, dtype=x.dtype)[:, None, :]
             * w_vec[None, :, None]).reshape(PACK, GROUP)    # (512, 128)

    # (3) Tiling: big blocks amortize the ~0.35 us per-step cost; ensure at
    # least 2 grid steps so the "parallel" axis feeds both v7x TensorCores.
    tile = min(tile_r, _round_up(r, 8))
    if _cdiv(r, tile) < 2 and r > 8:
        tile = max(8, _round_up(_cdiv(r, 2), 8))
    grid = (_cdiv(r, tile),)                       # ragged last block is masked

    out2 = pl.pallas_call(
        mydense_kernel,
        out_shape=jax.ShapeDtypeStruct((r, GROUP), x.dtype),
        grid=grid,
        in_specs=[
            pl.BlockSpec((tile, PACK), lambda i: (i, 0)),
            pl.BlockSpec((PACK, GROUP), lambda i: (0, 0)),
        ],
        out_specs=pl.BlockSpec((tile, GROUP), lambda i: (i, 0)),
        compiler_params=pltpu.CompilerParams(
            dimension_semantics=("parallel",),     # shard batch across TCs
            vmem_limit_bytes=48 * 1024 * 1024,     # fits v7x's 64 MiB VMEM
        ),
        cost_estimate=pl.CostEstimate(
            flops=2 * n_main * k,
            transcendentals=0,
            bytes_accessed=n_main * k * 4 + n_main * 4 + PACK * GROUP * 4,
        ),
    )(x2, w_blk)

    y_main = out2.reshape(n_main, 1)               # free row-major reshape

    if n_main == n:
        return y_main
    # (4) <=127-row tail stays in plain XLA (no pad, no garbage rows).
    y_tail = x[n_main:] @ w_vec[:, None]
    return jnp.concatenate([y_main, y_tail], axis=0)


def reference_forward(x, weights):
    h = x
    for w in weights:
        h = h @ w
    return h


if __name__ == "__main__":
    key = jax.random.PRNGKey(0)
    kx1, kx2, k0, k1, k2, k3 = jax.random.split(key, 6)

    # Deterministic stand-ins for the torch.randn parameters.
    weights = [
        jax.random.normal(k0, (4, 4), dtype=jnp.float32),
        jax.random.normal(k1, (4, 4), dtype=jnp.float32),
        jax.random.normal(k2, (4, 4), dtype=jnp.float32),
        jax.random.normal(k3, (4, 1), dtype=jnp.float32),
    ]

    # 1) The module's own tiny input (1,4): dispatched to the XLA fast path.
    x_small = jnp.ones((1, 4), dtype=jnp.float32)
    y_small = jax.block_until_ready(mydense_forward(x_small, weights))
    assert y_small.shape == (1, 1), y_small.shape
    assert jnp.allclose(y_small, reference_forward(x_small, weights),
                        atol=1e-4, rtol=1e-4)

    # 2) Modest aligned batch, forced through the Pallas kernel (grid of 2).
    x_big = jax.random.normal(kx1, (2048, 4), dtype=jnp.float32)
    y_big = jax.block_until_ready(
        mydense_forward(x_big, weights, min_kernel_rows=0))
    assert y_big.shape == (2048, 1), y_big.shape
    assert jnp.allclose(y_big, reference_forward(x_big, weights),
                        atol=1e-4, rtol=1e-4)

    # 3) Unaligned batch: kernel on the 128-aligned prefix + XLA tail.
    x_odd = jax.random.normal(kx2, (2050, 4), dtype=jnp.float32)
    y_odd = jax.block_until_ready(
        mydense_forward(x_odd, weights, min_kernel_rows=0))
    assert y_odd.shape == (2050, 1), y_odd.shape
    assert jnp.allclose(y_odd, reference_forward(x_odd, weights),
                        atol=1e-4, rtol=1e-4)

    print("KERNEL_OK")
</pallas_src>

<mosaic_0001>
module attributes {stable_mosaic.version = 11 : i64} {
  func.func @mydense_kernel(%arg0: i32, %arg1: memref<8x512xf32, #tpu.memory_space<vmem>>, %arg2: memref<512x128xf32, #tpu.memory_space<vmem>>, %arg3: memref<8x128xf32, #tpu.memory_space<vmem>>) attributes {dimension_semantics = [#tpu.dimension_semantics<parallel>], iteration_bounds = array<i64: 2>, scalar_prefetch = 0 : i64, scratch_operands = 0 : i64, tpu.core_type = #tpu.core_type<tc>, window_params = [{transform_indices = @transform_0, window_bounds = array<i64: 8, 512>}, {pipeline_mode = #tpu.pipeline_mode<synchronous>, transform_indices = @transform_1, window_bounds = array<i64: 512, 128>}, {transform_indices = @transform_2, window_bounds = array<i64: 8, 128>}]} {
    %c0 = arith.constant 0 : index
    %c0_0 = arith.constant 0 : index
    %0 = vector.load %arg1[%c0, %c0_0] : memref<8x512xf32, #tpu.memory_space<vmem>>, vector<8x512xf32>
    %c0_1 = arith.constant 0 : index
    %c0_2 = arith.constant 0 : index
    %1 = vector.load %arg2[%c0_1, %c0_2] : memref<512x128xf32, #tpu.memory_space<vmem>>, vector<512x128xf32>
    %cst = arith.constant dense<0.000000e+00> : vector<8x128xf32>
    %2 = tpu.matmul %0, %1, %cst {dimension_numbers = #tpu.dot_dimension_numbers<[1], [0], [0], [1], [0, 0, 1, 1], [], []>} : vector<8x512xf32>, vector<512x128xf32>, vector<8x128xf32> -> vector<8x128xf32>
    %c0_3 = arith.constant 0 : index
    %c0_4 = arith.constant 0 : index
    %3 = vector.load %arg3[%c0_3, %c0_4] : memref<8x128xf32, #tpu.memory_space<vmem>>, vector<8x128xf32>
    tpu.vector_store %arg3[%c0_3, %c0_4], %2 {strides = array<i32>} : memref<8x128xf32, #tpu.memory_space<vmem>>, vector<8x128xf32>,
    return
  }
  func.func @transform_0(%arg0: i32) -> (i32, i32) {
    %c0_i32 = arith.constant 0 : i32
    %c0_i32_0 = arith.constant 0 : i32
    return %arg0, %c0_i32 : i32, i32
  }
  func.func @transform_1(%arg0: i32) -> (i32, i32) {
    %c0_i32 = arith.constant 0 : i32
    %c0_i32_0 = arith.constant 0 : i32
    %c0_i32_1 = arith.constant 0 : i32
    return %c0_i32, %c0_i32_0 : i32, i32
  }
  func.func @transform_2(%arg0: i32) -> (i32, i32) {
    %c0_i32 = arith.constant 0 : i32
    %c0_i32_0 = arith.constant 0 : i32
    return %arg0, %c0_i32 : i32, i32
  }
}

</mosaic_0001>

<bundles_post_ra>
// kernel: tpu_custom_call.1
= control target key start
LH: loop header
LB: loop body
LE: loop exit
PB: predicated region body
PF: predicated region fallthrough
CT: control target
= control target key end

     0   :  { %7 = vsyncpa [#allocation3], 0  ;;  %s1040_s0 = inlined_call_operand.hbm [shape: f32[16,512], index: 0, kind: input, shape index: {}]   ;;  %s1041_s1 = inlined_call_operand.hbm [shape: f32[512,128], index: 1, kind: input, shape index: {}]   ;;  %s1042_s2 = inlined_call_operand.hbm [shape: f32[16,128], index: 2, kind: output, shape index: {}]  }
   0x1   :  { %9 = vsyncpa [#allocation3 + $0x1], 0 }
   0x2   :  { %10 = vsyncpa [#allocation6], 0 }
   0x3   :  { %11 = vsyncpa [#allocation4], 0 }
   0x4   :  { %13 = vsyncpa [#allocation4 + $0x1], 0  ;;  %s837_s9 = smov 0   ;;  %s839_s10 = smov 0  }
   0x5   :  { %s841_s11 = smov 0   ;;  %s843_s12 = smov 0  }
   0x6 LB: > { %s858_s13 = sadd.s32 4294967295, %s815_s12   ;;  %s478_s14 = sadd.s32 4294967294, %s815_s12   ;;  %s815_s12 = sphi %s843_s12, %s1062_s12   ;;  %s811_s11 = sphi %s841_s11, %s1061_s11   ;;  %s807_s10 = sphi %s839_s10, %s1060_s10   ;;  %s803_s9 = sphi %s837_s9, %s1059_s9  }
   0x7   : > { %p39_p0 = scmp.ne.s32.totalorder %s807_s10, %s803_s9  ;;  %p1043_p1 = scmp.eq.s32.totalorder %s858_s13, 0 }
   0x8   : > { %p90_p3 = scmp.eq.s32.totalorder %s478_s14, 1  ;;  %p479_p5 = scmp.ge.s32.totalorder %s815_s12, 1 }
   0x9   : > { %p867_p4 = por %p1043_p1, %p39_p0  ;;  %p97_p7 = scmp.lt.s32.totalorder %s815_s12, 3 }
   0xa   : > { %p872_p6 = por %p90_p3, %p39_p0  ;;  %s817_s18 = smov [#allocation5]  }
   0xb   : > { %s1046_s15 = scalar_select %p867_p4, 1, 0 }
   0xc   : > { %s1047_s16 = scalar_select %p872_p6, 1, 0 }
   0xd   : > { %p877_p8 = pnand %p479_p5, %p97_p7  ;;  %s109_s19 = sshll.u32 %s817_s18, 4  ;;  %s881_s19 = int_to_ptr.vmem [resolvable:$true] %s109_s19 }
   0xe   : > { %s893_s21 = sadd.s32 1, %s815_s12   ;;  %s26_s22 = sadd.s32 1, %s811_s11 }
   0xf   : > { %s1048_s17 = scalar_select %p877_p8, 1, 0 }
  0x10   : > { %p636_p9 = pneg %p877_p8  ;;  %s23_s23 = ssub.s32 %s815_s12, %s893_s21 }
  0x11   : > { %s687_s26 = scalar_lea.hbm %s1041_s1, 8192 }
  0x12   : > { %p888_p11 = pnand %p636_p9, %p1043_p1  ;;  %p688_p12 = scmp.ne.s32.totalorder %s1041_s1, %s687_s26 }
  0x13   : > { %p694_p5 = scmp.lt.u32.totalorder %s687_s26, %s1041_s1 }
  0x14   : > { %p689_p13 = pneg %p888_p11 }
  0x16   : > { %p690_p0 = pnand %p689_p13, %p688_p12 }
  0x18   : > { %p691_p3 = pneg %p690_p0 }
  0x1a   : > { %p696_p7 = pnand %p694_p5, %p691_p3 }
  0x1c   : > { %699 = shalt.err (!%p696_p7)
}
  0x1d   : > { %s700_s3 = scalar_lea.vmem %s881_s19, 8192  ;;  %p708_p2 = scmp.lt.s32.totalorder %s881_s19, %s881_s19 }
  0x1e   : > { %p701_p9 = scmp.ne.s32.totalorder %s881_s19, %s700_s3  ;;  %p709_p6 = scmp.lt.s32.totalorder %s700_s3, %s700_s3 }
  0x20   : > { %p703_p10 = pnand %p701_p9, %p689_p13  ;;  %p710_p4 = por %p709_p6, %p708_p2 }
  0x22   : > { %p704_p1 = pneg %p703_p10 }
  0x24   : > { %p711_p8 = pnand %p710_p4, %p704_p1 }
  0x26   : > { %714 = shalt.err (!%p711_p8)
}
  0x27   : > { %s818_s4 = smov 128   ;;  %s819_s5 = smov 8  }
  0x28   : > { %639 = dma.hbm_to_vmem [thread:$0]  (!%p888_p11), %s1041_s1, 8192, %s881_s19, [#allocation6], %s818_s4, %s818_s4, %s819_s5  }
  0x29   : > { %p24_p2 = scmp.eq.s32.totalorder %s23_s23, 0  ;;  %p33_p1 = scmp.ne.s32.totalorder %s811_s11, %s807_s10 }
  0x2a   : > { %p34_p4 = scmp.eq.s32.totalorder %s815_s12, 0  ;;  %p649_p6 = scmp.lt.s32.totalorder %s815_s12, 2 }
  0x2b   : > { %s924_s8 = scalar_select %p24_p2, %s811_s11, %s26_s22  }
  0x2c   : > { %p35_p8 = por %p34_p4, %p33_p1  ;;  %p1050_p10 = scmp.eq.s32.totalorder %s858_s13, 1 }
  0x2d   : > { %s123_s18 = sand.u32 1, %s811_s11   ;;  %s493_s24 = sshll.u32 %s815_s12, 9 }
  0x2e   : > { %p928_p12 = por %p1050_p10, %p33_p1  ;;  %s482_s25 = sshll.u32 %s123_s18, 5 }
  0x2f   : > { %s937_s27 = scalar_lea.hbm %s1040_s0, %s493_s24  ;;  %s127_s19 = scalar_lea.vmem [#allocation2], %s482_s25 }
  0x30   : > { %s135_s22 = sshll.u32 %s127_s19, 4  ;;  %p939_p11 = pnand %p649_p6, %p35_p8  ;;  %s943_s22 = int_to_ptr.vmem [resolvable:$true] %s135_s22 }
  0x31   : > { %s124_s28 = scalar_lea.sflag [#allocation3], %s123_s18  ;;  %s715_s29 = scalar_lea.hbm %s937_s27, 512 }
  0x32   : > { %p716_p13 = scmp.ne.s32.totalorder %s937_s27, %s715_s29  ;;  %p717_p0 = pneg %p939_p11 }
  0x33   : > { %s720_s4 = scalar_lea.hbm %s1040_s0, 1024  ;;  %p721_p7 = scmp.lt.u32.totalorder %s937_s27, %s1040_s0 }
  0x34   : > { %p718_p3 = pnand %p717_p0, %p716_p13  ;;  %p722_p9 = scmp.lt.u32.totalorder %s720_s4, %s715_s29 }
  0x35   : > { %p724_p1 = scmp.lt.u32.totalorder %s715_s29, %s937_s27 }
  0x36   : > { %p719_p5 = pneg %p718_p3  ;;  %p723_p2 = por %p722_p9, %p721_p7 }
  0x38   : > { %p725_p4 = por %p724_p1, %p723_p2 }
  0x3a   : > { %p726_p6 = pnand %p725_p4, %p719_p5 }
  0x3c   : > { %729 = shalt.err (!%p726_p6)
}
  0x3d   : > { %s730_s7 = scalar_lea.vmem %s943_s22, 512  ;;  %s820_s18 = smov [#allocation2]  }
  0x3e   : > { %p731_p8 = scmp.ne.s32.totalorder %s943_s22, %s730_s7  ;;  %s735_s24 = sshll.u32 %s820_s18, 4  ;;  %s736_s24 = int_to_ptr.vmem [resolvable:$false] %s735_s24 }
  0x3f   : > { %s737_s25 = scalar_lea.vmem %s736_s24, 1024  ;;  %p738_p3 = scmp.lt.s32.totalorder %s943_s22, %s736_s24 }
  0x40   : > { %p733_p10 = pnand %p731_p8, %p717_p0  ;;  %p739_p7 = scmp.lt.s32.totalorder %s737_s25, %s730_s7 }
  0x42   : > { %p734_p13 = pneg %p733_p10  ;;  %p740_p9 = por %p739_p7, %p738_p3 }
  0x44   : > { %p741_p2 = pnand %p740_p9, %p734_p13 }
  0x46   : > { %744 = shalt.err (!%p741_p2)
}
  0x47   : > { %643 = dma.hbm_to_vmem [thread:$0]  (!%p939_p11), %s937_s27, 512, %s943_s22, %s124_s28  }
  0x48   : > { %p1053_p5 = scmp.ne.s32.totalorder %s1048_s17, 0 }
  0x49   : > { %s973_s20 = sand.u32 (!%p1053_p5), 1, %s807_s10   ;;  %p1054_p0 = scmp.ne.s32.totalorder (!%p1053_p5), %s1046_s15, 0 }
  0x4a   : > { %144 = sbr.rel (%p1053_p5) target bundleno = 353 (0x161), region = 28  ;;  %s486_s26 = sshll.u32 (!%p1053_p5), %s973_s20, 5 }
  0x4b   : > { %s147_s19 = scalar_lea.sflag (!%p1053_p5), [#allocation3], %s973_s20  ;;  %s977_s29 = scalar_lea.vmem (!%p1053_p5), [#allocation2], %s486_s26 }
  0x51   : > { %790 = dma.done.wait (%p1054_p0), %s147_s19, 512  }
  0x52   : > { %792 = vsyncadd (%p1054_p0), %s147_s19, 4294966784  ;;  %p1055_p11 = scmp.eq.s32.totalorder %s858_s13, 0 }
  0x54   : > { %794 = dma.done.wait (%p1055_p11), [#allocation6], 8192   ;;  %p1056_p1 = pmov %p1055_p11 }
  0x55   : > { %v195_v0 = vld [vmem:[#allocation5 + $0x80] sm:$0xff]  ;;  %v196_v1 = vld [vmem:[#allocation5 + $0x88] sm:$0xff]  ;;  %v197_v11 = vld [vmem:[#allocation5 + $0x90] sm:$0xff]  ;;  %s488_s15 = sshll.u32 %s973_s20, 3  ;;  %s490_s17 = sshll.u32 %s858_s13, 7 }
  0x56   : > { %796 = vsyncadd (%p1056_p1), [#allocation6], 4294959104  ;;  %v227_v2 = vld [vmem:[#allocation5 + $0x180] sm:$0xff]  ;;  %v564_v3 = vpack.c.bf16 %v196_v1, %v195_v0  ;;  %v228_v4 = vld [vmem:[#allocation5 + $0x188] sm:$0xff]  ;;  %s174_s27 = scalar_lea.vmem [#allocation7], %s488_s15  ;;  %s996_s30 = scalar_lea.hbm %s1042_s2, %s490_s17 }
  0x57   : > { %v179_v5 = vld [vmem:[#allocation5] sm:$0xff]  ;;  %v180_v6 = vld [vmem:[#allocation5 + $0x8] sm:$0xff]  ;;  %v596_v7 = vpack.c.bf16 %v228_v4, %v227_v2  ;;  %v198_v13 = vld [vmem:[#allocation5 + $0x98] sm:$0xff]  ;;  %s398_s22 = sshll.u32 %s174_s27, 4  ;;  %s385_s3 = scalar_lea.sflag [#allocation4], %s973_s20  ;;  %s998_s22 = int_to_ptr.vmem [resolvable:$true] %s398_s22 }
  0x58   : > { %v566_v8 = vpack.c.bf16 %v180_v6, %v179_v5  ;;  %v211_v9 = vld [vmem:[#allocation5 + $0x100] sm:$0xff]  ;;  %v212_v10 = vld [vmem:[#allocation5 + $0x108] sm:$0xff]  ;;  %565 = vmatprep.subr.bf16.mxu0 %v564_v3  ;;  %v229_v14 = vld [vmem:[#allocation5 + $0x190] sm:$0xff]  ;;  %v568_v16 = vpack.c.bf16 %v198_v13, %v197_v11  ;;  %s745_s4 = scalar_lea.vmem %s998_s22, 128  ;;  %s821_s13 = smov [#allocation7]  }
  0x59   : > { %v598_v12 = vpack.c.bf16 %v212_v10, %v211_v9  ;;  %v230_v15 = vld [vmem:[#allocation5 + $0x198] sm:$0xff]  ;;  %597 = vmatprep.subr.bf16.mxu1 %v596_v7  ;;  %v181_v18 = vld [vmem:[#allocation5 + $0x10] sm:$0xff]  ;;  %v199_v23 = vld [vmem:[#allocation5 + $0xa0] sm:$0xff]  ;;  %p746_p4 = scmp.ne.s32.totalorder %s998_s22, %s745_s4  ;;  %s749_s5 = sshll.u32 %s821_s13, 4  ;;  %s750_s5 = int_to_ptr.vmem [resolvable:$false] %s749_s5 }
  0x5a   : > { %567 = vmatpush3.bf16.msra.mxu0 %v566_v8  ;;  %v600_v17 = vpack.c.bf16 %v230_v15, %v229_v14  ;;  %v182_v19 = vld [vmem:[#allocation5 + $0x18] sm:$0xff]  ;;  %v213_v20 = vld [vmem:[#allocation5 + $0x110] sm:$0xff]  ;;  %v200_v24 = vld [vmem:[#allocation5 + $0xa8] sm:$0xff]  ;;  %s751_s6 = scalar_lea.vmem %s750_s5, 256  ;;  %p752_p10 = scmp.lt.s32.totalorder %s998_s22, %s750_s5 }
  0x5b   : > { %599 = vmatpush3.bf16.msra.mxu1 %v598_v12  ;;  %v570_v21 = vpack.c.bf16 %v182_v19, %v181_v18  ;;  %v214_v22 = vld [vmem:[#allocation5 + $0x118] sm:$0xff]  ;;  %569 = vmatprep.subr.bf16.mxu0 %v568_v16  ;;  %v572_v26 = vpack.c.bf16 %v200_v24, %v199_v23  ;;  %v231_v27 = vld [vmem:[#allocation5 + $0x1a0] sm:$0xff]  ;;  %v232_v28 = vld [vmem:[#allocation5 + $0x1a8] sm:$0xff]  ;;  %p747_p6 = pnand %p746_p4, %p928_p12  ;;  %p753_p13 = scmp.lt.s32.totalorder %s751_s6, %s745_s4 }
  0x5c   : > { %601 = vmatprep.subr.bf16.mxu1 %v600_v17  ;;  %v602_v25 = vpack.c.bf16 %v214_v22, %v213_v20  ;;  %v183_v29 = vld [vmem:[#allocation5 + $0x20] sm:$0xff]  ;;  %v604_v30 = vpack.c.bf16 %v232_v28, %v231_v27  ;;  %v184_v31 = vld [vmem:[#allocation5 + $0x28] sm:$0xff]  ;;  %v201_v35 = vld [vmem:[#allocation5 + $0xb0] sm:$0xff] }
  0x5d   : > { %v215_v32 = vld [vmem:[#allocation5 + $0x120] sm:$0xff]  ;;  %v216_v33 = vld [vmem:[#allocation5 + $0x128] sm:$0xff]  ;;  %v574_v34 = vpack.c.bf16 %v184_v31, %v183_v29  ;;  %v202_v36 = vld [vmem:[#allocation5 + $0xb8] sm:$0xff]  ;;  %p748_p8 = pneg %p747_p6  ;;  %p754_p3 = por %p753_p13, %p752_p10 }
  0x5e   : > { %571 = vmatpush3.bf16.msra.mxu0 %v570_v21  ;;  %v233_v37 = vld [vmem:[#allocation5 + $0x1b0] sm:$0xff]  ;;  %v606_v38 = vpack.c.bf16 %v216_v33, %v215_v32  ;;  %v576_v39 = vpack.c.bf16 %v202_v36, %v201_v35  ;;  %v234_v40 = vld [vmem:[#allocation5 + $0x1b8] sm:$0xff]  ;;  %v203_v46 = vld [vmem:[#allocation5 + $0xc0] sm:$0xff] }
  0x5f   : > { %603 = vmatpush3.bf16.msra.mxu1 %v602_v25  ;;  %573 = vmatprep.subr.bf16.mxu0 %v572_v26  ;;  %v185_v41 = vld [vmem:[#allocation5 + $0x30] sm:$0xff]  ;;  %v186_v42 = vld [vmem:[#allocation5 + $0x38] sm:$0xff]  ;;  %v608_v43 = vpack.c.bf16 %v234_v40, %v233_v37  ;;  %v204_v47 = vld [vmem:[#allocation5 + $0xc8] sm:$0xff]  ;;  %p755_p7 = pnand %p754_p3, %p748_p8 }
  0x60   : > { %605 = vmatprep.subr.bf16.mxu1 %v604_v30  ;;  %v217_v44 = vld [vmem:[#allocation5 + $0x130] sm:$0xff]  ;;  %v218_v45 = vld [vmem:[#allocation5 + $0x138] sm:$0xff]  ;;  %v235_v48 = vld [vmem:[#allocation5 + $0x1c0] sm:$0xff]  ;;  %v578_v50 = vpack.c.bf16 %v186_v42, %v185_v41  ;;  %v580_v52 = vpack.c.bf16 %v204_v47, %v203_v46 }
  0x61   : > { %v236_v49 = vld [vmem:[#allocation5 + $0x1c8] sm:$0xff]  ;;  %v610_v51 = vpack.c.bf16 %v218_v45, %v217_v44  ;;  %v187_v53 = vld [vmem:[#allocation5 + $0x40] sm:$0xff]  ;;  %v205_v58 = vld [vmem:[#allocation5 + $0xd0] sm:$0xff] }
  0x62   : > { %575 = vmatpush3.bf16.msra.mxu0 %v574_v34  ;;  %v188_v54 = vld [vmem:[#allocation5 + $0x48] sm:$0xff]  ;;  %v219_v55 = vld [vmem:[#allocation5 + $0x140] sm:$0xff]  ;;  %v612_v56 = vpack.c.bf16 %v236_v49, %v235_v48  ;;  %v206_v59 = vld [vmem:[#allocation5 + $0xd8] sm:$0xff] }
  0x63   : > { %607 = vmatpush3.bf16.msra.mxu1 %v606_v38  ;;  %577 = vmatprep.subr.bf16.mxu0 %v576_v39  ;;  %v220_v57 = vld [vmem:[#allocation5 + $0x148] sm:$0xff]  ;;  %v237_v60 = vld [vmem:[#allocation5 + $0x1d0] sm:$0xff]  ;;  %v238_v61 = vld [vmem:[#allocation5 + $0x1d8] sm:$0xff]  ;;  %v582_v62 = vpack.c.bf16 %v188_v54, %v187_v53  ;;  %v584_v0 = vpack.c.bf16 %v206_v59, %v205_v58 }
  0x64   : > { %609 = vmatprep.subr.bf16.mxu1 %v608_v43  ;;  %v614_v63 = vpack.c.bf16 %v220_v57, %v219_v55  ;;  %v189_v1 = vld [vmem:[#allocation5 + $0x50] sm:$0xff]  ;;  %v190_v2 = vld [vmem:[#allocation5 + $0x58] sm:$0xff]  ;;  %v616_v4 = vpack.c.bf16 %v238_v61, %v237_v60  ;;  %v207_v6 = vld [vmem:[#allocation5 + $0xe0] sm:$0xff] }
  0x65   : > { %v221_v3 = vld [vmem:[#allocation5 + $0x150] sm:$0xff]  ;;  %v222_v5 = vld [vmem:[#allocation5 + $0x158] sm:$0xff]  ;;  %v208_v7 = vld [vmem:[#allocation5 + $0xe8] sm:$0xff]  ;;  %v586_v10 = vpack.c.bf16 %v190_v2, %v189_v1 }
  0x66   : > { %579 = vmatpush3.bf16.msra.mxu0 %v578_v50  ;;  %v239_v8 = vld [vmem:[#allocation5 + $0x1e0] sm:$0xff]  ;;  %v240_v9 = vld [vmem:[#allocation5 + $0x1e8] sm:$0xff]  ;;  %v618_v13 = vpack.c.bf16 %v222_v5, %v221_v3  ;;  %v588_v14 = vpack.c.bf16 %v208_v7, %v207_v6  ;;  %v178_v17 = vld [vmem:[%s977_s29 + $0x18] sm:$0xff] }
  0x67   : > { %611 = vmatpush3.bf16.msra.mxu1 %v610_v51  ;;  %581 = vmatprep.subr.bf16.mxu0 %v580_v52  ;;  %v191_v11 = vld [vmem:[#allocation5 + $0x60] sm:$0xff]  ;;  %v192_v12 = vld [vmem:[#allocation5 + $0x68] sm:$0xff]  ;;  %v620_v18 = vpack.c.bf16 %v240_v9, %v239_v8  ;;  %v209_v20 = vld [vmem:[#allocation5 + $0xf0] sm:$0xff] }
  0x68   : > { %613 = vmatprep.subr.bf16.mxu1 %v612_v56  ;;  %v223_v15 = vld [vmem:[#allocation5 + $0x160] sm:$0xff]  ;;  %v176_v16 = vld [vmem:[%s977_s29 + $0x8] sm:$0xff]  ;;  %v210_v21 = vld [vmem:[#allocation5 + $0xf8] sm:$0xff]  ;;  %377 = vmatprep.mubr.f32.mxu1 %v178_v17  ;;  %v590_v24 = vpack.c.bf16 %v192_v12, %v191_v11 }
  0x69   : > { %v224_v19 = vld [vmem:[#allocation5 + $0x168] sm:$0xff]  ;;  %307 = vmatprep.mubr.f32.mxu0 %v176_v16  ;;  %v241_v22 = vld [vmem:[#allocation5 + $0x1f0] sm:$0xff]  ;;  %v242_v23 = vld [vmem:[#allocation5 + $0x1f8] sm:$0xff]  ;;  %v592_v26 = vpack.c.bf16 %v210_v21, %v209_v20 }
  0x6a   : > { %583 = vmatpush3.bf16.msra.mxu0 %v582_v62  ;;  %v622_v25 = vpack.c.bf16 %v224_v19, %v223_v15  ;;  %v193_v27 = vld [vmem:[#allocation5 + $0x70] sm:$0xff]  ;;  %v194_v28 = vld [vmem:[#allocation5 + $0x78] sm:$0xff]  ;;  %v624_v29 = vpack.c.bf16 %v242_v23, %v241_v22  ;;  %v175_v34 = vld [vmem:[%s977_s29] sm:$0xff] }
  0x6b   : > { %615 = vmatpush3.bf16.msra.mxu1 %v614_v63  ;;  %585 = vmatprep.subr.bf16.mxu0 %v584_v0  ;;  %v225_v30 = vld [vmem:[#allocation5 + $0x170] sm:$0xff]  ;;  %v226_v31 = vld [vmem:[#allocation5 + $0x178] sm:$0xff]  ;;  %v594_v32 = vpack.c.bf16 %v194_v28, %v193_v27 }
  0x6c   : > { %617 = vmatprep.subr.bf16.mxu1 %v616_v4  ;;  %v626_v33 = vpack.c.bf16 %v226_v31, %v225_v30  ;;  %v177_v35 = vld [vmem:[%s977_s29 + $0x10] sm:$0xff] }
  0x6e   : > { %587 = vmatpush3.bf16.msra.mxu0 %v586_v10 }
  0x6f   : > { %619 = vmatpush3.bf16.msra.mxu1 %v618_v13  ;;  %589 = vmatprep.subr.bf16.mxu0 %v588_v14 }
  0x70   : > { %621 = vmatprep.subr.bf16.mxu1 %v620_v18 }
  0x72   : > { %591 = vmatpush3.bf16.msra.mxu0 %v590_v24 }
  0x73   : > { %623 = vmatpush3.bf16.msra.mxu1 %v622_v25  ;;  %593 = vmatprep.subr.bf16.mxu0 %v592_v26 }
  0x74   : > { %625 = vmatprep.subr.bf16.mxu1 %v624_v29 }
  0x76   : > { %595 = vmatpush3.bf16.msra.mxu0 %v594_v32 }
  0x77   : > { %627 = vmatpush3.bf16.msra.mxu1 %v626_v33 }
  0x79   : > { %308 = vmatmul.mubr.f32.vlgmr.msra.gmra.mrb[0].mxu0 %v175_v34 }
  0x7a   : > { %378 = vmatmul.mubr.f32.vlgmr.msra.gmra.mrb[0].mxu1 %v177_v35 }
 0x14c   : > { %v526_v36 = vpop.f32.mrb[0].mxu0 }
 0x14d   : > { %v561_v37 = vpop.f32.mrb[0].mxu1  ;;  %v527_v38 = vpop.f32.mrb[1].mxu0 }
 0x14e   : > { %v528_v39 = vadd.f32 %v527_v38, %v526_v36  ;;  %v562_v40 = vpop.f32.mrb[1].mxu1 }
 0x14f   : > { %v563_v41 = vadd.f32 %v562_v40, %v561_v37 }
 0x151   : > { %v380_v42 = vadd.f32 %v563_v41, %v528_v39 }
 0x153   : > { %383 = vst [vmem:[%s174_s27] sm:$0xff] %v380_v42 }
 0x154   : > { %758 = shalt.err (!%p755_p7)
}
 0x155   : > { %s759_s7 = scalar_lea.hbm %s996_s30, 128  ;;  %s763_s25 = scalar_lea.hbm %s1042_s2, 256 }
 0x156   : > { %p760_p9 = scmp.ne.s32.totalorder %s996_s30, %s759_s7  ;;  %p764_p0 = scmp.lt.u32.totalorder %s996_s30, %s1042_s2 }
 0x157   : > { %p765_p11 = scmp.lt.u32.totalorder %s763_s25, %s759_s7  ;;  %p767_p4 = scmp.lt.u32.totalorder %s759_s7, %s996_s30 }
 0x158   : > { %p761_p2 = pnand %p760_p9, %p928_p12 }
 0x159   : > { %p766_p1 = por %p765_p11, %p764_p0 }
 0x15a   : > { %p762_p5 = pneg %p761_p2 }
 0x15b   : > { %p768_p6 = por %p767_p4, %p766_p1 }
 0x15d   : > { %p769_p8 = pnand %p768_p6, %p762_p5 }
 0x15f   : > { %772 = shalt.err (!%p769_p8)
}
 0x160   : > { %634 = dma.vmem_to_hbm [thread:$0]  (%p928_p12), %s998_s22, 128, %s996_s30, %s385_s3  }
 0x161 PF: > { %s410_s19 = sand.u32 1, %s803_s9   ;;  %p1057_p10 = scmp.ne.s32.totalorder %s1047_s16, 0 }
 0x162   : > { %p1058_p13 = scmp.ge.s32.totalorder %s815_s12, 2  ;;  %s411_s29 = scalar_lea.sflag [#allocation4], %s410_s19 }
 0x164   : > { %p645_p3 = pnand %p1058_p13, %p1057_p10 }
 0x166   : > { %798 = dma.done.wait (!%p645_p3), %s411_s29, 128  }
 0x167   : > { %800 = vsyncadd (!%p645_p3), %s411_s29, 4294967168  ;;  %p16_p7 = scmp.ge.s32.totalorder %s893_s21, 4   ;;  %s1059_s9 = smov %s807_s10 }
 0x168   : > { %s1060_s10 = smov %s811_s11  ;;  %s1061_s11 = smov %s924_s8 }
 0x169   : > { %s1062_s12 = smov %s893_s21  ;;  %18 = sbr.rel (!%p16_p7) target bundleno = 6 (0x6), region = 77 }
 0x170   :  { %416 = vsyncpa [#allocation3], 1 }
 0x171   :  { %418 = vsyncpa [#allocation3 + $0x1], 1 }
 0x172   :  { %419 = vsyncpa [#allocation6], 1 }
 0x173   :  { %420 = vsyncpa [#allocation4], 1 }
 0x174   :  { %422 = vsyncpa [#allocation4 + $0x1], 1 }

</bundles_post_ra>
